<compile_context>
chip_gen: v7x
topology: tpu7x:2x2x1
jax: 0.10.0
libtpu: 0.0.40
codegen_flags: <defaults>
</compile_context>

<pallas_src>
import math
import functools

import jax
import jax.numpy as jnp
from jax.experimental import pallas as pl
from jax.experimental.pallas import tpu as pltpu


def _round_up(x, m):
    return ((x + m - 1) // m) * m


def _conv_matmul_kernel(p_ref, w_ref, b_ref, out_ref, acc_ref):
    """One (tm, to) output tile of  patches @ w_blended + bias.

    p_ref  : VMEM (tm, tk)  bf16  im2col patch tile
    w_ref  : VMEM (tk, to)  bf16  pre-blended weight tile
    b_ref  : VMEM (1,  to)  f32   pre-blended bias tile
    out_ref: VMEM (tm, to)  f32
    acc_ref: VMEM (tm, to)  f32   K-reduction accumulator (resident across k axis)
    """
    k = pl.program_id(2)

    @pl.when(k == 0)
    def _():
        acc_ref[...] = jnp.zeros_like(acc_ref)

    # Single bf16 MXU pass, f32 accumulation (no Precision.HIGHEST emulation).
    acc_ref[...] += jnp.dot(p_ref[...], w_ref[...],
                            preferred_element_type=jnp.float32)

    @pl.when(k == pl.num_programs(2) - 1)
    def _():
        out_ref[...] = (acc_ref[...] + b_ref[...]).astype(out_ref.dtype)


def curve_conv2d(x, weights, biases, coeffs_t, *, stride=(1, 1), padding=(0, 0),
                 dilation=(1, 1), tm=512, to=256, tk=512, use_pallas=None):
    """Forward pass of curves_pam.Conv2d (orient=None, groups=1).

    x        : (N, C, H, W)              f32, NCHW
    weights  : (num_bends, O, C, KH, KW) f32, OIHW per bend
    biases   : (num_bends, O)            f32
    coeffs_t : (num_bends,)              f32
    returns  : (N, O, OH, OW)            f32, NCHW
    """
    N, C, H, W = x.shape
    nb, O, Cg, KH, KW = weights.shape
    assert Cg == C, "groups != 1 not supported"  # TODO(synk): grouped conv
    sh, sw = stride
    ph, pw = padding
    dh, dw = dilation
    OH = (H + 2 * ph - dh * (KH - 1) - 1) // sh + 1
    OW = (W + 2 * pw - dw * (KW - 1) - 1) // sw + 1

    # ---- blend the per-bend parameters ONCE in the wrapper (hoisted out of kernel) ----
    coeffs = jnp.asarray(coeffs_t, dtype=jnp.float32)
    w_t = jnp.einsum("b,boihw->oihw", coeffs, weights)      # (O, C, KH, KW)
    b_t = jnp.einsum("b,bo->o", coeffs, biases)             # (O,)

    K = C * KH * KW
    if use_pallas is None:
        # Tiny-K / tiny-O layers are dominated by (8,128) padding waste in a custom
        # kernel; route them to XLA's conv and keep Pallas for real channel counts.
        use_pallas = (K >= 128) and (O >= 128)
    if not use_pallas:
        y = jax.lax.conv_general_dilated(
            x, w_t, window_strides=stride, padding=[(ph, ph), (pw, pw)],
            rhs_dilation=dilation, dimension_numbers=("NCHW", "OIHW", "NCHW"))
        return y + b_t[None, :, None, None]

    # ---- im2col on an NHWC view (plain-JAX glue) -------------------------------------
    x_nhwc = jnp.transpose(x, (0, 2, 3, 1))                 # (N, H, W, C)
    xpad = jnp.pad(x_nhwc, ((0, 0), (ph, ph), (pw, pw), (0, 0)))
    cols = []
    for kh in range(KH):
        for kw in range(KW):
            cols.append(
                xpad[:, kh * dh: kh * dh + sh * OH: sh,
                        kw * dw: kw * dw + sw * OW: sw, :])  # (N, OH, OW, C)
    patches = jnp.stack(cols, axis=3)                        # (N, OH, OW, KH*KW, C)
    patches = patches.reshape(N * OH * OW, KH * KW * C)      # (M, K), K = (kh, kw, c)

    # Blended weight matrix in matching (kh, kw, c) -> O layout.
    w_mat = jnp.transpose(w_t, (2, 3, 1, 0)).reshape(K, O)   # (K, O)

    M = patches.shape[0]
    tm = min(tm, _round_up(M, 128))
    tk = min(tk, _round_up(K, 128))
    to = min(to, _round_up(O, 128))
    M_pad = _round_up(M, tm)
    K_pad = _round_up(K, tk)
    O_pad = _round_up(O, to)

    # bf16 operands for a single-pass MXU matmul; bias stays f32 (added post-accum).
    patches_p = jnp.pad(patches, ((0, M_pad - M), (0, K_pad - K))).astype(jnp.bfloat16)
    w_p = jnp.pad(w_mat, ((0, K_pad - K), (0, O_pad - O))).astype(jnp.bfloat16)
    b_p = jnp.pad(b_t, (0, O_pad - O)).reshape(1, O_pad).astype(jnp.float32)

    grid = (M_pad // tm, O_pad // to, K_pad // tk)           # reduction axis last
    out = pl.pallas_call(
        _conv_matmul_kernel,
        out_shape=jax.ShapeDtypeStruct((M_pad, O_pad), jnp.float32),
        grid_spec=pltpu.PrefetchScalarGridSpec(
            num_scalar_prefetch=0,
            grid=grid,
            in_specs=[
                pl.BlockSpec((tm, tk), lambda i, j, k: (i, k)),   # patches tile
                pl.BlockSpec((tk, to), lambda i, j, k: (k, j)),   # blended weight tile
                pl.BlockSpec((1, to), lambda i, j, k: (0, j)),    # blended bias tile
            ],
            out_specs=pl.BlockSpec((tm, to), lambda i, j, k: (i, j)),
            scratch_shapes=[pltpu.VMEM((tm, to), jnp.float32)],
        ),
        compiler_params=pltpu.CompilerParams(
            dimension_semantics=("parallel", "parallel", "arbitrary")),
    )(patches_p, w_p, b_p)

    out = out[:M, :O].reshape(N, OH, OW, O)
    return jnp.transpose(out, (0, 3, 1, 2))                  # NCHW (PyTorch parity)


def _reference(x, weights, biases, coeffs_t, stride, padding, dilation,
               compute_dtype=jnp.float32, precision=jax.lax.Precision.HIGHEST):
    """Pure-JAX reference of the same forward (for verification)."""
    coeffs = jnp.asarray(coeffs_t, dtype=jnp.float32)
    w_t = jnp.einsum("b,boihw->oihw", coeffs, weights)
    b_t = jnp.einsum("b,bo->o", coeffs, biases)
    ph, pw = padding
    y = jax.lax.conv_general_dilated(
        x.astype(compute_dtype), w_t.astype(compute_dtype),
        window_strides=stride,
        padding=[(ph, ph), (pw, pw)],
        rhs_dilation=dilation,
        dimension_numbers=("NCHW", "OIHW", "NCHW"),
        preferred_element_type=jnp.float32,
        precision=precision,
    )
    return y + b_t[None, :, None, None]


if __name__ == "__main__":
    # Module config (mirrors Conv2d.__init__): in=4, out=8, k=3, 3 bends, pad=1, stride=1.
    in_channels, out_channels, kernel_size = 4, 8, 3
    fix_points = [True, False, True]
    num_bends = len(fix_points)
    stride, padding, dilation = (1, 1), (1, 1), (1, 1)

    # Deterministic parameter init (same scheme as reset_parameters: U(-stdv, stdv)).
    n = in_channels * kernel_size * kernel_size
    stdv = 1.0 / math.sqrt(n)
    key = jax.random.PRNGKey(0)
    kx, kw, kb = jax.random.split(key, 3)

    weights = jax.random.uniform(
        kw, (num_bends, out_channels, in_channels, kernel_size, kernel_size),
        minval=-stdv, maxval=stdv, dtype=jnp.float32)
    biases = jax.random.uniform(
        kb, (num_bends, out_channels), minval=-stdv, maxval=stdv, dtype=jnp.float32)

    # Input (NCHW) and Bezier curve coefficients at t=0.3.
    x = jax.random.normal(kx, (2, in_channels, 16, 16), dtype=jnp.float32)
    t = 0.3
    coeffs_t = jnp.array([(1 - t) ** 2, 2 * t * (1 - t), t ** 2], dtype=jnp.float32)

    # Force the Pallas path even though this demo shape would normally dispatch to XLA.
    fwd = jax.jit(functools.partial(
        curve_conv2d, stride=stride, padding=padding, dilation=dilation,
        use_pallas=True))
    y = fwd(x, weights, biases, coeffs_t)
    y = jax.block_until_ready(y)

    # Matched-precision reference (bf16 operands, f32 accumulation — same as the kernel).
    y_ref_mx = _reference(x, weights, biases, coeffs_t, stride, padding, dilation,
                          compute_dtype=jnp.bfloat16,
                          precision=jax.lax.Precision.DEFAULT)
    # Full-f32 semantic reference (loose tolerance: bf16 rounding noise only).
    y_ref_hi = _reference(x, weights, biases, coeffs_t, stride, padding, dilation,
                          compute_dtype=jnp.float32,
                          precision=jax.lax.Precision.HIGHEST)

    assert y.shape == (2, out_channels, 16, 16), y.shape
    assert jnp.allclose(y, y_ref_mx, atol=1e-3, rtol=1e-3), \
        float(jnp.max(jnp.abs(y - y_ref_mx)))
    assert jnp.allclose(y, y_ref_hi, atol=5e-2, rtol=5e-2), \
        float(jnp.max(jnp.abs(y - y_ref_hi)))

    print("KERNEL_OK")
</pallas_src>

<mosaic_0001>
module attributes {stable_mosaic.version = 11 : i64} {
  func.func @_conv_matmul_kernel(%arg0: i32, %arg1: i32, %arg2: i32, %arg3: memref<512x128xbf16, #tpu.memory_space<vmem>>, %arg4: memref<128x128xbf16, #tpu.memory_space<vmem>>, %arg5: memref<1x128xf32, #tpu.memory_space<vmem>>, %arg6: memref<512x128xf32, #tpu.memory_space<vmem>>, %arg7: memref<512x128xf32, #tpu.memory_space<vmem>>) attributes {dimension_semantics = [#tpu.dimension_semantics<parallel>, #tpu.dimension_semantics<parallel>, #tpu.dimension_semantics<arbitrary>], iteration_bounds = array<i64: 1, 1, 1>, scalar_prefetch = 0 : i64, scratch_operands = 1 : i64, tpu.core_type = #tpu.core_type<tc>, window_params = [{transform_indices = @transform_0, window_bounds = array<i64: 512, 128>}, {transform_indices = @transform_1, window_bounds = array<i64: 128, 128>}, {transform_indices = @transform_2, window_bounds = array<i64: 1, 128>}, {transform_indices = @transform_3, window_bounds = array<i64: 512, 128>}]} {
    %c0_i32 = arith.constant 0 : i32
    %0 = arith.cmpi eq, %arg2, %c0_i32 : i32
    %1 = arith.extui %0 : i1 to i32
    %c0_i32_0 = arith.constant 0 : i32
    %2 = arith.cmpi ne, %1, %c0_i32_0 : i32
    scf.if %2 {
      %cst_10 = arith.constant 0.000000e+00 : f32
      %12 = vector.broadcast %cst_10 : f32 to vector<512x128xf32>
      %c0_11 = arith.constant 0 : index
      %c0_12 = arith.constant 0 : index
      %13 = vector.load %arg7[%c0_11, %c0_12] : memref<512x128xf32, #tpu.memory_space<vmem>>, vector<512x128xf32>
      tpu.vector_store %arg7[%c0_11, %c0_12], %12 {strides = array<i32>} : memref<512x128xf32, #tpu.memory_space<vmem>>, vector<512x128xf32>,
    } else {
    }
    %c0 = arith.constant 0 : index
    %c0_1 = arith.constant 0 : index
    %3 = vector.load %arg7[%c0, %c0_1] : memref<512x128xf32, #tpu.memory_space<vmem>>, vector<512x128xf32>
    %c0_2 = arith.constant 0 : index
    %c0_3 = arith.constant 0 : index
    %4 = vector.load %arg3[%c0_2, %c0_3] : memref<512x128xbf16, #tpu.memory_space<vmem>>, vector<512x128xbf16>
    %c0_4 = arith.constant 0 : index
    %c0_5 = arith.constant 0 : index
    %5 = vector.load %arg4[%c0_4, %c0_5] : memref<128x128xbf16, #tpu.memory_space<vmem>>, vector<128x128xbf16>
    %cst = arith.constant dense<0.000000e+00> : vector<512x128xf32>
    %6 = tpu.matmul %4, %5, %cst {dimension_numbers = #tpu.dot_dimension_numbers<[1], [0], [0], [1], [0, 0, 1, 1], [], []>} : vector<512x128xbf16>, vector<128x128xbf16>, vector<512x128xf32> -> vector<512x128xf32>
    %7 = arith.addf %3, %6 : vector<512x128xf32>
    %c0_6 = arith.constant 0 : index
    %c0_7 = arith.constant 0 : index
    %8 = vector.load %arg7[%c0_6, %c0_7] : memref<512x128xf32, #tpu.memory_space<vmem>>, vector<512x128xf32>
    tpu.vector_store %arg7[%c0_6, %c0_7], %7 {strides = array<i32>} : memref<512x128xf32, #tpu.memory_space<vmem>>, vector<512x128xf32>,
    %c0_i32_8 = arith.constant 0 : i32
    %9 = arith.cmpi eq, %arg2, %c0_i32_8 : i32
    %10 = arith.extui %9 : i1 to i32
    %c0_i32_9 = arith.constant 0 : i32
    %11 = arith.cmpi ne, %10, %c0_i32_9 : i32
    scf.if %11 {
      %c0_10 = arith.constant 0 : index
      %c0_11 = arith.constant 0 : index
      %12 = vector.load %arg7[%c0_10, %c0_11] : memref<512x128xf32, #tpu.memory_space<vmem>>, vector<512x128xf32>
      %c0_12 = arith.constant 0 : index
      %c0_13 = arith.constant 0 : index
      %13 = vector.load %arg5[%c0_12, %c0_13] : memref<1x128xf32, #tpu.memory_space<vmem>>, vector<1x128xf32>
      %14 = vector.broadcast %13 : vector<1x128xf32> to vector<512x128xf32>
      %15 = arith.addf %12, %14 : vector<512x128xf32>
      %c0_14 = arith.constant 0 : index
      %c0_15 = arith.constant 0 : index
      %16 = vector.load %arg6[%c0_14, %c0_15] : memref<512x128xf32, #tpu.memory_space<vmem>>, vector<512x128xf32>
      tpu.vector_store %arg6[%c0_14, %c0_15], %15 {strides = array<i32>} : memref<512x128xf32, #tpu.memory_space<vmem>>, vector<512x128xf32>,
    } else {
    }
    return
  }
  func.func @transform_0(%arg0: i32, %arg1: i32, %arg2: i32) -> (i32, i32) {
    %c0_i32 = arith.constant 0 : i32
    return %arg0, %arg2 : i32, i32
  }
  func.func @transform_1(%arg0: i32, %arg1: i32, %arg2: i32) -> (i32, i32) {
    %c0_i32 = arith.constant 0 : i32
    return %arg2, %arg1 : i32, i32
  }
  func.func @transform_2(%arg0: i32, %arg1: i32, %arg2: i32) -> (i32, i32) {
    %c0_i32 = arith.constant 0 : i32
    %c0_i32_0 = arith.constant 0 : i32
    return %c0_i32, %arg1 : i32, i32
  }
  func.func @transform_3(%arg0: i32, %arg1: i32, %arg2: i32) -> (i32, i32) {
    %c0_i32 = arith.constant 0 : i32
    return %arg0, %arg1 : i32, i32
  }
}

</mosaic_0001>

<bundles_post_ra>
// kernel: curve_conv2d.1
= control target key start
LH: loop header
LB: loop body
LE: loop exit
PB: predicated region body
PF: predicated region fallthrough
CT: control target
= control target key end

     0   :  { %s1708_s1 = inlined_call_operand.vmem [shape: bf16[128,128], index: 1, kind: input, shape index: {}]   ;;  %s1709_s0 = inlined_call_operand.vmem [shape: bf16[512,128], index: 0, kind: input, shape index: {}]   ;;  %s1710_s2 = inlined_call_operand.vmem [shape: f32[1,128], index: 2, kind: input, shape index: {}]   ;;  %s1711_s3 = inlined_call_operand.vmem [shape: f32[512,128], index: 3, kind: output, shape index: {}]  }
   0x1   :  { %v1267_v0 = vld [vmem:[%s1708_s1] sm:$0xff]   ;;  %v1268_v1 = vld [vmem:[%s1708_s1 + $0x8] sm:$0xff]   ;;  %v1269_v2 = vld [vmem:[%s1708_s1 + $0x10] sm:$0xff]  }
   0x2   :  { %1171 = vmatprep.subr.bf16.mxu0 %v1267_v0  ;;  %1251 = vmatprep.subr.bf16.mxu1 %v1267_v0  ;;  %v1270_v3 = vld [vmem:[%s1708_s1 + $0x18] sm:$0xff]   ;;  %v1275_v4 = vld [vmem:[%s1709_s0] sm:$0xff]   ;;  %v1272_v7 = vld [vmem:[%s1708_s1 + $0x28] sm:$0xff]  }
   0x3   :  { %1172 = vmatpush3.bf16.msra.mxu0 %v1267_v0  ;;  %1259 = vmatpush3.bf16.msra.mxu1 %v1267_v0  ;;  %v1276_v5 = vld [vmem:[%s1709_s0 + $0x80] sm:$0xff]   ;;  %v1273_v8 = vld [vmem:[%s1708_s1 + $0x30] sm:$0xff]   ;;  %v1274_v9 = vld [vmem:[%s1708_s1 + $0x38] sm:$0xff]  }
   0x4   :  { %1173 = vmatprep.subr.bf16.mxu0 %v1268_v1  ;;  %1252 = vmatprep.subr.bf16.mxu1 %v1268_v1  ;;  %v1271_v6 = vld [vmem:[%s1708_s1 + $0x20] sm:$0xff]   ;;  %v1277_v10 = vld [vmem:[%s1709_s0 + $0x8] sm:$0xff]   ;;  %v1279_v12 = vld [vmem:[%s1709_s0 + $0x10] sm:$0xff]  }
   0x5   :  { %1187 = vmatprep.mubr.bf16.mxu0 %v1275_v4  ;;  %1219 = vmatprep.mubr.bf16.mxu1 %v1276_v5  ;;  %v1278_v11 = vld [vmem:[%s1709_s0 + $0x88] sm:$0xff]   ;;  %v1280_v13 = vld [vmem:[%s1709_s0 + $0x90] sm:$0xff]   ;;  %v1281_v14 = vld [vmem:[%s1709_s0 + $0x18] sm:$0xff]  }
   0x6   :  { %v1282_v15 = vld [vmem:[%s1709_s0 + $0x98] sm:$0xff]   ;;  %v1283_v16 = vld [vmem:[%s1709_s0 + $0x20] sm:$0xff]   ;;  %v1285_v18 = vld [vmem:[%s1709_s0 + $0x28] sm:$0xff]  }
   0x7   :  { %1174 = vmatpush3.bf16.msra.mxu0 %v1268_v1  ;;  %1260 = vmatpush3.bf16.msra.mxu1 %v1268_v1  ;;  %v1284_v17 = vld [vmem:[%s1709_s0 + $0xa0] sm:$0xff]   ;;  %v1286_v19 = vld [vmem:[%s1709_s0 + $0xa8] sm:$0xff]   ;;  %v1287_v20 = vld [vmem:[%s1709_s0 + $0x30] sm:$0xff]  }
   0x8   :  { %1175 = vmatprep.subr.bf16.mxu0 %v1269_v2  ;;  %1253 = vmatprep.subr.bf16.mxu1 %v1269_v2  ;;  %v1288_v21 = vld [vmem:[%s1709_s0 + $0xb0] sm:$0xff]   ;;  %v1289_v22 = vld [vmem:[%s1709_s0 + $0x38] sm:$0xff]   ;;  %v1291_v24 = vld [vmem:[%s1709_s0 + $0x40] sm:$0xff]  }
   0x9   :  { %v1290_v23 = vld [vmem:[%s1709_s0 + $0xb8] sm:$0xff]   ;;  %v1292_v25 = vld [vmem:[%s1709_s0 + $0xc0] sm:$0xff]   ;;  %v1293_v26 = vld [vmem:[%s1709_s0 + $0x48] sm:$0xff]  }
   0xa   :  { %v1294_v27 = vld [vmem:[%s1709_s0 + $0xc8] sm:$0xff]   ;;  %v1295_v28 = vld [vmem:[%s1709_s0 + $0x50] sm:$0xff]   ;;  %v1297_v30 = vld [vmem:[%s1709_s0 + $0x58] sm:$0xff]  }
   0xb   :  { %1176 = vmatpush3.bf16.msra.mxu0 %v1269_v2  ;;  %1261 = vmatpush3.bf16.msra.mxu1 %v1269_v2  ;;  %v1296_v29 = vld [vmem:[%s1709_s0 + $0xd0] sm:$0xff]   ;;  %v1298_v31 = vld [vmem:[%s1709_s0 + $0xd8] sm:$0xff]   ;;  %v1299_v32 = vld [vmem:[%s1709_s0 + $0x60] sm:$0xff]  }
   0xc   :  { %1177 = vmatprep.subr.bf16.mxu0 %v1270_v3  ;;  %1254 = vmatprep.subr.bf16.mxu1 %v1270_v3  ;;  %v1300_v33 = vld [vmem:[%s1709_s0 + $0xe0] sm:$0xff]   ;;  %v1301_v34 = vld [vmem:[%s1709_s0 + $0x68] sm:$0xff]   ;;  %v1303_v36 = vld [vmem:[%s1709_s0 + $0x70] sm:$0xff]  }
   0xd   :  { %v1302_v35 = vld [vmem:[%s1709_s0 + $0xe8] sm:$0xff]   ;;  %v1304_v37 = vld [vmem:[%s1709_s0 + $0xf0] sm:$0xff]   ;;  %v1305_v38 = vld [vmem:[%s1709_s0 + $0x78] sm:$0xff]  }
   0xe   :  { %v1306_v39 = vld [vmem:[%s1709_s0 + $0xf8] sm:$0xff]   ;;  %v1450_v40 = vld [vmem:[%s1710_s2] ss:$0 sm:$0xff] }
   0xf   :  { %1178 = vmatpush3.bf16.msra.mxu0 %v1270_v3  ;;  %1262 = vmatpush3.bf16.msra.mxu1 %v1270_v3 }
  0x10   :  { %1179 = vmatprep.subr.bf16.mxu0 %v1271_v6  ;;  %1255 = vmatprep.subr.bf16.mxu1 %v1271_v6 }
  0x13   :  { %1180 = vmatpush3.bf16.msra.mxu0 %v1271_v6  ;;  %1263 = vmatpush3.bf16.msra.mxu1 %v1271_v6 }
  0x14   :  { %1181 = vmatprep.subr.bf16.mxu0 %v1272_v7  ;;  %1256 = vmatprep.subr.bf16.mxu1 %v1272_v7 }
  0x17   :  { %1182 = vmatpush3.bf16.msra.mxu0 %v1272_v7  ;;  %1264 = vmatpush3.bf16.msra.mxu1 %v1272_v7 }
  0x18   :  { %1183 = vmatprep.subr.bf16.mxu0 %v1273_v8  ;;  %1257 = vmatprep.subr.bf16.mxu1 %v1273_v8 }
  0x1b   :  { %1184 = vmatpush3.bf16.msra.mxu0 %v1273_v8  ;;  %1265 = vmatpush3.bf16.msra.mxu1 %v1273_v8 }
  0x1c   :  { %1185 = vmatprep.subr.bf16.mxu0 %v1274_v9  ;;  %1258 = vmatprep.subr.bf16.mxu1 %v1274_v9 }
  0x1f   :  { %1186 = vmatpush3.bf16.msra.mxu0 %v1274_v9  ;;  %1266 = vmatpush3.bf16.msra.mxu1 %v1274_v9 }
  0x22   :  { %1188 = vmatmul.mubr.bf16.vlgmr.msra.gmra.mrb[0].mxu0 %v1277_v10  ;;  %1220 = vmatmul.mubr.bf16.vlgmr.msra.gmra.mrb[0].mxu1 %v1278_v11 }
  0x23   :  { %1191 = vmatprep.mubr.bf16.mxu0 %v1279_v12  ;;  %1223 = vmatprep.mubr.bf16.mxu1 %v1280_v13 }
  0x2a   :  { %1192 = vmatmul.mubr.bf16.gmra.mrb[4].mxu0 %v1281_v14  ;;  %1224 = vmatmul.mubr.bf16.gmra.mrb[4].mxu1 %v1282_v15 }
  0x2b   :  { %1195 = vmatprep.mubr.bf16.mxu0 %v1283_v16  ;;  %1227 = vmatprep.mubr.bf16.mxu1 %v1284_v17 }
  0x32   :  { %1196 = vmatmul.mubr.bf16.gmra.mrb[8].mxu0 %v1285_v18  ;;  %1228 = vmatmul.mubr.bf16.gmra.mrb[8].mxu1 %v1286_v19 }
  0x33   :  { %1199 = vmatprep.mubr.bf16.mxu0 %v1287_v20  ;;  %1231 = vmatprep.mubr.bf16.mxu1 %v1288_v21 }
  0x3a   :  { %1200 = vmatmul.mubr.bf16.gmra.mrb[12].mxu0 %v1289_v22  ;;  %1232 = vmatmul.mubr.bf16.gmra.mrb[12].mxu1 %v1290_v23 }
  0x3b   :  { %1203 = vmatprep.mubr.bf16.mxu0 %v1291_v24  ;;  %1235 = vmatprep.mubr.bf16.mxu1 %v1292_v25 }
  0x42   :  { %1204 = vmatmul.mubr.bf16.gmra.mrb[16].mxu0 %v1293_v26  ;;  %1236 = vmatmul.mubr.bf16.gmra.mrb[16].mxu1 %v1294_v27 }
  0x43   :  { %1207 = vmatprep.mubr.bf16.mxu0 %v1295_v28  ;;  %1239 = vmatprep.mubr.bf16.mxu1 %v1296_v29 }
  0x4a   :  { %1208 = vmatmul.mubr.bf16.gmra.mrb[20].mxu0 %v1297_v30  ;;  %1240 = vmatmul.mubr.bf16.gmra.mrb[20].mxu1 %v1298_v31 }
  0x4b   :  { %1211 = vmatprep.mubr.bf16.mxu0 %v1299_v32  ;;  %1243 = vmatprep.mubr.bf16.mxu1 %v1300_v33 }
  0x52   :  { %1212 = vmatmul.mubr.bf16.gmra.mrb[24].mxu0 %v1301_v34  ;;  %1244 = vmatmul.mubr.bf16.gmra.mrb[24].mxu1 %v1302_v35 }
  0x53   :  { %1215 = vmatprep.mubr.bf16.mxu0 %v1303_v36  ;;  %1247 = vmatprep.mubr.bf16.mxu1 %v1304_v37 }
  0x5a   :  { %1216 = vmatmul.mubr.bf16.gmra.mrb[28].mxu0 %v1305_v38  ;;  %1248 = vmatmul.mubr.bf16.gmra.mrb[28].mxu1 %v1306_v39 }
  0xf5   :  { %v1189_v41 = vpop.f32.mrb[0].mxu0  ;;  %v1221_v42 = vpop.f32.mrb[0].mxu1 }
  0xf6   :  { %v960_v43 = vadd.f32 %v1189_v41, %v1450_v40  ;;  %v992_v44 = vadd.f32 %v1221_v42, %v1450_v40  ;;  %v501_v45 = vpop.f32.mrb[1].mxu0  ;;  %v629_v46 = vpop.f32.mrb[1].mxu1 }
  0xf7   :  { %v958_v47 = vadd.f32 %v1450_v40, %v501_v45  ;;  %v990_v48 = vadd.f32 %v1450_v40, %v629_v46  ;;  %v1190_v49 = vpop.f32.mrb[2].mxu0  ;;  %v1222_v50 = vpop.f32.mrb[2].mxu1 }
  0xf8   :  { %1024 = vst [vmem:[%s1711_s3 + $0x10] sm:$0xff] %v960_v43  ;;  %1056 = vst [vmem:[%s1711_s3 + $0x110] sm:$0xff] %v992_v44  ;;  %v961_v51 = vadd.f32 %v1190_v49, %v1450_v40  ;;  %v993_v52 = vadd.f32 %v1222_v50, %v1450_v40  ;;  %v504_v53 = vpop.f32.mrb[3].mxu0  ;;  %v632_v54 = vpop.f32.mrb[3].mxu1 }
  0xf9   :  { %1022 = vst [vmem:[%s1711_s3] sm:$0xff] %v958_v47  ;;  %1054 = vst [vmem:[%s1711_s3 + $0x100] sm:$0xff] %v990_v48  ;;  %v959_v55 = vadd.f32 %v1450_v40, %v504_v53  ;;  %v991_v56 = vadd.f32 %v1450_v40, %v632_v54 }
  0xfa   :  { %1025 = vst [vmem:[%s1711_s3 + $0x18] sm:$0xff] %v961_v51  ;;  %1057 = vst [vmem:[%s1711_s3 + $0x118] sm:$0xff] %v993_v52 }
  0xfb   :  { %1023 = vst [vmem:[%s1711_s3 + $0x8] sm:$0xff] %v959_v55  ;;  %1055 = vst [vmem:[%s1711_s3 + $0x108] sm:$0xff] %v991_v56 }
  0xfd   :  { %v1193_v57 = vpop.f32.mrb[4].mxu0  ;;  %v1225_v58 = vpop.f32.mrb[4].mxu1 }
  0xfe   :  { %v964_v59 = vadd.f32 %v1193_v57, %v1450_v40  ;;  %v996_v60 = vadd.f32 %v1225_v58, %v1450_v40  ;;  %v517_v61 = vpop.f32.mrb[5].mxu0  ;;  %v645_v62 = vpop.f32.mrb[5].mxu1 }
  0xff   :  { %v962_v63 = vadd.f32 %v1450_v40, %v517_v61  ;;  %v994_v0 = vadd.f32 %v1450_v40, %v645_v62  ;;  %v1194_v1 = vpop.f32.mrb[6].mxu0  ;;  %v1226_v2 = vpop.f32.mrb[6].mxu1 }
 0x100   :  { %1028 = vst [vmem:[%s1711_s3 + $0x30] sm:$0xff] %v964_v59  ;;  %1060 = vst [vmem:[%s1711_s3 + $0x130] sm:$0xff] %v996_v60  ;;  %v965_v3 = vadd.f32 %v1194_v1, %v1450_v40  ;;  %v997_v4 = vadd.f32 %v1226_v2, %v1450_v40  ;;  %v520_v5 = vpop.f32.mrb[7].mxu0  ;;  %v648_v6 = vpop.f32.mrb[7].mxu1 }
 0x101   :  { %1026 = vst [vmem:[%s1711_s3 + $0x20] sm:$0xff] %v962_v63  ;;  %1058 = vst [vmem:[%s1711_s3 + $0x120] sm:$0xff] %v994_v0  ;;  %v963_v7 = vadd.f32 %v1450_v40, %v520_v5  ;;  %v995_v8 = vadd.f32 %v1450_v40, %v648_v6 }
 0x102   :  { %1029 = vst [vmem:[%s1711_s3 + $0x38] sm:$0xff] %v965_v3  ;;  %1061 = vst [vmem:[%s1711_s3 + $0x138] sm:$0xff] %v997_v4 }
 0x103   :  { %1027 = vst [vmem:[%s1711_s3 + $0x28] sm:$0xff] %v963_v7  ;;  %1059 = vst [vmem:[%s1711_s3 + $0x128] sm:$0xff] %v995_v8 }
 0x105   :  { %v1197_v9 = vpop.f32.mrb[8].mxu0  ;;  %v1229_v10 = vpop.f32.mrb[8].mxu1 }
 0x106   :  { %v968_v11 = vadd.f32 %v1197_v9, %v1450_v40  ;;  %v1000_v12 = vadd.f32 %v1229_v10, %v1450_v40  ;;  %v533_v13 = vpop.f32.mrb[9].mxu0  ;;  %v661_v14 = vpop.f32.mrb[9].mxu1 }
 0x107   :  { %v966_v15 = vadd.f32 %v1450_v40, %v533_v13  ;;  %v998_v16 = vadd.f32 %v1450_v40, %v661_v14  ;;  %v1198_v17 = vpop.f32.mrb[10].mxu0  ;;  %v1230_v18 = vpop.f32.mrb[10].mxu1 }
 0x108   :  { %1032 = vst [vmem:[%s1711_s3 + $0x50] sm:$0xff] %v968_v11  ;;  %1064 = vst [vmem:[%s1711_s3 + $0x150] sm:$0xff] %v1000_v12  ;;  %v969_v19 = vadd.f32 %v1198_v17, %v1450_v40  ;;  %v1001_v20 = vadd.f32 %v1230_v18, %v1450_v40  ;;  %v536_v21 = vpop.f32.mrb[11].mxu0  ;;  %v664_v22 = vpop.f32.mrb[11].mxu1 }
 0x109   :  { %1030 = vst [vmem:[%s1711_s3 + $0x40] sm:$0xff] %v966_v15  ;;  %1062 = vst [vmem:[%s1711_s3 + $0x140] sm:$0xff] %v998_v16  ;;  %v967_v23 = vadd.f32 %v1450_v40, %v536_v21  ;;  %v999_v24 = vadd.f32 %v1450_v40, %v664_v22 }
 0x10a   :  { %1033 = vst [vmem:[%s1711_s3 + $0x58] sm:$0xff] %v969_v19  ;;  %1065 = vst [vmem:[%s1711_s3 + $0x158] sm:$0xff] %v1001_v20 }
 0x10b   :  { %1031 = vst [vmem:[%s1711_s3 + $0x48] sm:$0xff] %v967_v23  ;;  %1063 = vst [vmem:[%s1711_s3 + $0x148] sm:$0xff] %v999_v24 }
 0x10d   :  { %v1201_v25 = vpop.f32.mrb[12].mxu0  ;;  %v1233_v26 = vpop.f32.mrb[12].mxu1 }
 0x10e   :  { %v972_v27 = vadd.f32 %v1201_v25, %v1450_v40  ;;  %v1004_v28 = vadd.f32 %v1233_v26, %v1450_v40  ;;  %v549_v29 = vpop.f32.mrb[13].mxu0  ;;  %v677_v30 = vpop.f32.mrb[13].mxu1 }
 0x10f   :  { %v970_v31 = vadd.f32 %v1450_v40, %v549_v29  ;;  %v1002_v32 = vadd.f32 %v1450_v40, %v677_v30  ;;  %v1202_v33 = vpop.f32.mrb[14].mxu0  ;;  %v1234_v34 = vpop.f32.mrb[14].mxu1 }
 0x110   :  { %1036 = vst [vmem:[%s1711_s3 + $0x70] sm:$0xff] %v972_v27  ;;  %1068 = vst [vmem:[%s1711_s3 + $0x170] sm:$0xff] %v1004_v28  ;;  %v973_v35 = vadd.f32 %v1202_v33, %v1450_v40  ;;  %v1005_v36 = vadd.f32 %v1234_v34, %v1450_v40  ;;  %v552_v37 = vpop.f32.mrb[15].mxu0  ;;  %v680_v38 = vpop.f32.mrb[15].mxu1 }
 0x111   :  { %1034 = vst [vmem:[%s1711_s3 + $0x60] sm:$0xff] %v970_v31  ;;  %1066 = vst [vmem:[%s1711_s3 + $0x160] sm:$0xff] %v1002_v32  ;;  %v971_v39 = vadd.f32 %v1450_v40, %v552_v37  ;;  %v1003_v41 = vadd.f32 %v1450_v40, %v680_v38 }
 0x112   :  { %1037 = vst [vmem:[%s1711_s3 + $0x78] sm:$0xff] %v973_v35  ;;  %1069 = vst [vmem:[%s1711_s3 + $0x178] sm:$0xff] %v1005_v36 }
 0x113   :  { %1035 = vst [vmem:[%s1711_s3 + $0x68] sm:$0xff] %v971_v39  ;;  %1067 = vst [vmem:[%s1711_s3 + $0x168] sm:$0xff] %v1003_v41 }
 0x115   :  { %v1205_v42 = vpop.f32.mrb[16].mxu0  ;;  %v1237_v43 = vpop.f32.mrb[16].mxu1 }
 0x116   :  { %v976_v44 = vadd.f32 %v1205_v42, %v1450_v40  ;;  %v1008_v45 = vadd.f32 %v1237_v43, %v1450_v40  ;;  %v565_v46 = vpop.f32.mrb[17].mxu0  ;;  %v693_v47 = vpop.f32.mrb[17].mxu1 }
 0x117   :  { %v974_v48 = vadd.f32 %v1450_v40, %v565_v46  ;;  %v1006_v49 = vadd.f32 %v1450_v40, %v693_v47  ;;  %v1206_v50 = vpop.f32.mrb[18].mxu0  ;;  %v1238_v51 = vpop.f32.mrb[18].mxu1 }
 0x118   :  { %1040 = vst [vmem:[%s1711_s3 + $0x90] sm:$0xff] %v976_v44  ;;  %1072 = vst [vmem:[%s1711_s3 + $0x190] sm:$0xff] %v1008_v45  ;;  %v977_v52 = vadd.f32 %v1206_v50, %v1450_v40  ;;  %v1009_v53 = vadd.f32 %v1238_v51, %v1450_v40  ;;  %v568_v54 = vpop.f32.mrb[19].mxu0  ;;  %v696_v55 = vpop.f32.mrb[19].mxu1 }
 0x119   :  { %1038 = vst [vmem:[%s1711_s3 + $0x80] sm:$0xff] %v974_v48  ;;  %1070 = vst [vmem:[%s1711_s3 + $0x180] sm:$0xff] %v1006_v49  ;;  %v975_v56 = vadd.f32 %v1450_v40, %v568_v54  ;;  %v1007_v57 = vadd.f32 %v1450_v40, %v696_v55 }
 0x11a   :  { %1041 = vst [vmem:[%s1711_s3 + $0x98] sm:$0xff] %v977_v52  ;;  %1073 = vst [vmem:[%s1711_s3 + $0x198] sm:$0xff] %v1009_v53 }
 0x11b   :  { %1039 = vst [vmem:[%s1711_s3 + $0x88] sm:$0xff] %v975_v56  ;;  %1071 = vst [vmem:[%s1711_s3 + $0x188] sm:$0xff] %v1007_v57 }
 0x11d   :  { %v1209_v58 = vpop.f32.mrb[20].mxu0  ;;  %v1241_v59 = vpop.f32.mrb[20].mxu1 }
 0x11e   :  { %v980_v60 = vadd.f32 %v1209_v58, %v1450_v40  ;;  %v1012_v61 = vadd.f32 %v1241_v59, %v1450_v40  ;;  %v581_v62 = vpop.f32.mrb[21].mxu0  ;;  %v709_v63 = vpop.f32.mrb[21].mxu1 }
 0x11f   :  { %v978_v0 = vadd.f32 %v1450_v40, %v581_v62  ;;  %v1010_v1 = vadd.f32 %v1450_v40, %v709_v63  ;;  %v1210_v2 = vpop.f32.mrb[22].mxu0  ;;  %v1242_v3 = vpop.f32.mrb[22].mxu1 }
 0x120   :  { %1044 = vst [vmem:[%s1711_s3 + $0xb0] sm:$0xff] %v980_v60  ;;  %1076 = vst [vmem:[%s1711_s3 + $0x1b0] sm:$0xff] %v1012_v61  ;;  %v981_v4 = vadd.f32 %v1210_v2, %v1450_v40  ;;  %v1013_v5 = vadd.f32 %v1242_v3, %v1450_v40  ;;  %v584_v6 = vpop.f32.mrb[23].mxu0  ;;  %v712_v7 = vpop.f32.mrb[23].mxu1 }
 0x121   :  { %1042 = vst [vmem:[%s1711_s3 + $0xa0] sm:$0xff] %v978_v0  ;;  %1074 = vst [vmem:[%s1711_s3 + $0x1a0] sm:$0xff] %v1010_v1  ;;  %v979_v8 = vadd.f32 %v1450_v40, %v584_v6  ;;  %v1011_v9 = vadd.f32 %v1450_v40, %v712_v7 }
 0x122   :  { %1045 = vst [vmem:[%s1711_s3 + $0xb8] sm:$0xff] %v981_v4  ;;  %1077 = vst [vmem:[%s1711_s3 + $0x1b8] sm:$0xff] %v1013_v5 }
 0x123   :  { %1043 = vst [vmem:[%s1711_s3 + $0xa8] sm:$0xff] %v979_v8  ;;  %1075 = vst [vmem:[%s1711_s3 + $0x1a8] sm:$0xff] %v1011_v9 }
 0x125   :  { %v1213_v10 = vpop.f32.mrb[24].mxu0  ;;  %v1245_v11 = vpop.f32.mrb[24].mxu1 }
 0x126   :  { %v984_v12 = vadd.f32 %v1213_v10, %v1450_v40  ;;  %v1016_v13 = vadd.f32 %v1245_v11, %v1450_v40  ;;  %v597_v14 = vpop.f32.mrb[25].mxu0  ;;  %v725_v15 = vpop.f32.mrb[25].mxu1 }
 0x127   :  { %v982_v16 = vadd.f32 %v1450_v40, %v597_v14  ;;  %v1014_v17 = vadd.f32 %v1450_v40, %v725_v15  ;;  %v1214_v18 = vpop.f32.mrb[26].mxu0  ;;  %v1246_v19 = vpop.f32.mrb[26].mxu1 }
 0x128   :  { %1048 = vst [vmem:[%s1711_s3 + $0xd0] sm:$0xff] %v984_v12  ;;  %1080 = vst [vmem:[%s1711_s3 + $0x1d0] sm:$0xff] %v1016_v13  ;;  %v985_v20 = vadd.f32 %v1214_v18, %v1450_v40  ;;  %v1017_v21 = vadd.f32 %v1246_v19, %v1450_v40  ;;  %v600_v22 = vpop.f32.mrb[27].mxu0  ;;  %v728_v23 = vpop.f32.mrb[27].mxu1 }
 0x129   :  { %1046 = vst [vmem:[%s1711_s3 + $0xc0] sm:$0xff] %v982_v16  ;;  %1078 = vst [vmem:[%s1711_s3 + $0x1c0] sm:$0xff] %v1014_v17  ;;  %v983_v24 = vadd.f32 %v1450_v40, %v600_v22  ;;  %v1015_v25 = vadd.f32 %v1450_v40, %v728_v23 }
 0x12a   :  { %1049 = vst [vmem:[%s1711_s3 + $0xd8] sm:$0xff] %v985_v20  ;;  %1081 = vst [vmem:[%s1711_s3 + $0x1d8] sm:$0xff] %v1017_v21 }
 0x12b   :  { %1047 = vst [vmem:[%s1711_s3 + $0xc8] sm:$0xff] %v983_v24  ;;  %1079 = vst [vmem:[%s1711_s3 + $0x1c8] sm:$0xff] %v1015_v25 }
 0x12d   :  { %v1217_v26 = vpop.f32.mrb[28].mxu0  ;;  %v1249_v27 = vpop.f32.mrb[28].mxu1 }
 0x12e   :  { %v988_v28 = vadd.f32 %v1217_v26, %v1450_v40  ;;  %v1020_v29 = vadd.f32 %v1249_v27, %v1450_v40  ;;  %v613_v30 = vpop.f32.mrb[29].mxu0  ;;  %v741_v31 = vpop.f32.mrb[29].mxu1 }
 0x12f   :  { %v986_v32 = vadd.f32 %v1450_v40, %v613_v30  ;;  %v1018_v33 = vadd.f32 %v1450_v40, %v741_v31  ;;  %v1218_v34 = vpop.f32.mrb[30].mxu0  ;;  %v1250_v35 = vpop.f32.mrb[30].mxu1 }
 0x130   :  { %1052 = vst [vmem:[%s1711_s3 + $0xf0] sm:$0xff] %v988_v28  ;;  %1084 = vst [vmem:[%s1711_s3 + $0x1f0] sm:$0xff] %v1020_v29  ;;  %v989_v36 = vadd.f32 %v1218_v34, %v1450_v40  ;;  %v1021_v37 = vadd.f32 %v1250_v35, %v1450_v40  ;;  %v616_v38 = vpop.f32.mrb[31].mxu0  ;;  %v744_v39 = vpop.f32.mrb[31].mxu1 }
 0x131   :  { %1050 = vst [vmem:[%s1711_s3 + $0xe0] sm:$0xff] %v986_v32  ;;  %1082 = vst [vmem:[%s1711_s3 + $0x1e0] sm:$0xff] %v1018_v33  ;;  %v987_v41 = vadd.f32 %v1450_v40, %v616_v38  ;;  %v1019_v42 = vadd.f32 %v1450_v40, %v744_v39 }
 0x132   :  { %1053 = vst [vmem:[%s1711_s3 + $0xf8] sm:$0xff] %v989_v36  ;;  %1085 = vst [vmem:[%s1711_s3 + $0x1f8] sm:$0xff] %v1021_v37 }
 0x133   :  { %1051 = vst [vmem:[%s1711_s3 + $0xe8] sm:$0xff] %v987_v41  ;;  %1083 = vst [vmem:[%s1711_s3 + $0x1e8] sm:$0xff] %v1019_v42 }

</bundles_post_ra>
